<compile_context>
chip_gen: v7x
topology: tpu7x:2x2x1
jax: 0.10.0
libtpu: 0.0.40
codegen_flags: <defaults>
</compile_context>

<pallas_src>
import functools
import math

import jax
import jax.numpy as jnp
from jax import lax
from jax.experimental import pallas as pl
from jax.experimental.pallas import tpu as pltpu


def _mha_head_kernel(x_ref, w_ref, o_ref, *, hd, scale):
    """One (batch, head) grid step: per-head QKV projection + attention.

    x_ref: (S, D)    -- one batch row of the input (re-used across all heads).
    w_ref: (D, 3*hd) -- this head's [Wq_h | Wk_h | Wv_h] weight columns.
    o_ref: (S, hd)   -- this head's attention output block.
    """
    cdt = x_ref.dtype  # compute dtype for MXU operands (bf16-friendly)

    # Per-head slice of the QKV projection: one MXU matmul, f32 accumulation.
    # The (S, 3*hd) result lives only inside this grid step, so regalloc /
    # VMEM pressure is bounded to a single head's working set.
    qkv = jnp.dot(x_ref[...], w_ref[...], preferred_element_type=jnp.float32)

    # Static, in-register slices (no dynamic lane offsets).  Fold the softmax
    # scale into q: O(S*hd) multiplies instead of O(S^2).
    q = (qkv[:, :hd] * scale).astype(cdt)
    k = qkv[:, hd:2 * hd].astype(cdt)
    v = qkv[:, 2 * hd:].astype(cdt)

    # q @ k^T without materializing k.T: contract the last dims of both.
    scores = lax.dot_general(
        q, k,
        dimension_numbers=(((1,), (1,)), ((), ())),
        preferred_element_type=jnp.float32,
    )  # (S, S) f32

    m = jnp.max(scores, axis=-1, keepdims=True)
    p = jnp.exp(scores - m)
    denom = jnp.sum(p, axis=-1, keepdims=True)  # (S, 1) f32

    # PV matmul in the input dtype with f32 accumulation; normalize afterwards
    # with an EXACT reciprocal (cheap on a (S,1) operand, keeps tolerance tight).
    attn = jnp.dot(p.astype(cdt), v, preferred_element_type=jnp.float32)
    attn = attn * pl.reciprocal(denom, approx=False)

    o_ref[...] = attn.astype(o_ref.dtype)


def _vmem_limit_bytes():
    # v5e/v6e: 128 MiB physical VMEM per core; v7x: 64 MiB.  Per the review:
    # ~96 MiB limit on v5e/v6e, ~48 MiB on v7x (leave headroom for
    # Mosaic-internal scratch).
    try:
        cap = pltpu.get_tpu_info().vmem_capacity_bytes
    except Exception:
        cap = 128 * 1024 * 1024
    return int(min(cap * 3 // 4, 100 * 1024 * 1024))


@functools.partial(jax.jit, static_argnames=("nheads",))
def multi_head_attention(x, w_qkv_t, *, nheads):
    """x: (B, S, D); w_qkv_t: (D, 3D) = transpose of the nn.Linear QKV weight."""
    B, S, D = x.shape
    assert D % nheads == 0, "Dimension must be divisible by number of heads"
    hd = D // nheads

    # PyTorch quirk: sqrt(key.size(-1)) is taken AFTER key.transpose(-2, -1),
    # i.e. the scale is 1/sqrt(seq_len), NOT 1/sqrt(head_dim).
    scale = 1.0 / math.sqrt(S)

    # Re-pack W^T (D, 3D) -> (H, D, 3*hd) so head h's [Wq_h | Wk_h | Wv_h]
    # columns are one contiguous, per-step DMA block (streamed & prefetched by
    # the pipeline) instead of a full resident double-buffered (D, 3D) weight.
    # One-time layout prep outside the kernel; in a real model this would be
    # done once at parameter-load time.
    w_heads = (
        w_qkv_t.reshape(D, 3, nheads, hd)
        .transpose(2, 0, 1, 3)
        .reshape(nheads, D, 3 * hd)
    )

    attn = pl.pallas_call(
        functools.partial(_mha_head_kernel, hd=hd, scale=scale),
        out_shape=jax.ShapeDtypeStruct((B, nheads, S, hd), x.dtype),
        grid=(B, nheads),
        in_specs=[
            # x[b]: same block for every head -> only re-DMA'd when b changes.
            pl.BlockSpec((None, S, D), lambda b, h: (b, 0, 0)),
            # This head's weight columns: small block, usefully double-buffered.
            pl.BlockSpec((None, D, 3 * hd), lambda b, h: (h, 0, 0)),
        ],
        out_specs=pl.BlockSpec((None, None, S, hd), lambda b, h: (b, h, 0, 0)),
        compiler_params=pltpu.CompilerParams(
            # Every (b, h) step is fully independent (no carried state), so
            # both axes are megacore-shardable on v7x; harmless on v5e/v6e.
            dimension_semantics=("parallel", "parallel"),
            vmem_limit_bytes=_vmem_limit_bytes(),
        ),
    )(x, w_heads)

    # PyTorch quirk: raw .view() of the contiguous (B, H, S, hd) tensor into
    # (B, S, H*hd) -- a plain row-major reshape (free in XLA), no transpose.
    return attn.reshape(B, S, D)


def _reference(x, w_qkv_t, nheads):
    """Pure-JAX replica of the PyTorch forward (including its quirks)."""
    B, S, D = x.shape
    hd = D // nheads
    qkv = x @ w_qkv_t
    q, k, v = jnp.split(qkv, 3, axis=-1)
    q = q.reshape(B, S, nheads, hd).transpose(0, 2, 1, 3)
    k = k.reshape(B, S, nheads, hd).transpose(0, 2, 1, 3)
    v = v.reshape(B, S, nheads, hd).transpose(0, 2, 1, 3)
    scores = jnp.einsum("bhqd,bhkd->bhqk", q, k) / math.sqrt(S)  # quirk: sqrt(S)
    scores = jax.nn.softmax(scores, axis=-1)
    attn = jnp.einsum("bhqk,bhkd->bhqd", scores, v)               # (B, H, S, hd)
    return attn.reshape(B, S, D)                                  # quirk: raw view


if __name__ == "__main__":
    # Small, divisibility-consistent shapes: D % nheads == 0.
    B, S, D, H = 2, 8, 32, 4

    key = jax.random.PRNGKey(0)
    kx, kw = jax.random.split(key)
    x = jax.random.normal(kx, (B, S, D), dtype=jnp.float32)

    # nn.Linear(D, 3D, bias=False) weight is (3D, D); deterministic init
    # (uniform with PyTorch's default bound 1/sqrt(D)).
    bound = 1.0 / math.sqrt(D)
    w = jax.random.uniform(kw, (3 * D, D), dtype=jnp.float32,
                           minval=-bound, maxval=bound)
    w_qkv_t = w.T  # (D, 3D) so that x @ w_qkv_t == x @ W^T

    out = multi_head_attention(x, w_qkv_t, nheads=H)
    out = jax.block_until_ready(out)

    ref = _reference(x, w_qkv_t, H)
    assert out.shape == x.shape, "Attention output must have the same size as input"
    assert jnp.allclose(out, ref, atol=1e-4, rtol=1e-4), "mismatch vs reference"

    print("KERNEL_OK")
</pallas_src>

<mosaic_0001>
module attributes {stable_mosaic.version = 11 : i64} {
  func.func @_mha_head_kernel(%arg0: i32, %arg1: i32, %arg2: memref<1x8x32xf32, #tpu.memory_space<vmem>>, %arg3: memref<1x32x24xf32, #tpu.memory_space<vmem>>, %arg4: memref<1x1x8x8xf32, #tpu.memory_space<vmem>>) attributes {dimension_semantics = [#tpu.dimension_semantics<parallel>, #tpu.dimension_semantics<parallel>], iteration_bounds = array<i64: 2, 4>, scalar_prefetch = 0 : i64, scratch_operands = 0 : i64, tpu.core_type = #tpu.core_type<tc>, window_params = [{transform_indices = @transform_0, window_bounds = array<i64: 1, 8, 32>}, {transform_indices = @transform_1, window_bounds = array<i64: 1, 32, 24>}, {transform_indices = @transform_2, window_bounds = array<i64: 1, 1, 8, 8>}]} {
    %c0 = arith.constant 0 : index
    %c0_0 = arith.constant 0 : index
    %c0_1 = arith.constant 0 : index
    %0 = vector.load %arg2[%c0, %c0_0, %c0_1] : memref<1x8x32xf32, #tpu.memory_space<vmem>>, vector<1x8x32xf32>
    %1 = vector.shape_cast %0 : vector<1x8x32xf32> to vector<8x32xf32>
    %c0_2 = arith.constant 0 : index
    %c0_3 = arith.constant 0 : index
    %c0_4 = arith.constant 0 : index
    %2 = vector.load %arg3[%c0_2, %c0_3, %c0_4] : memref<1x32x24xf32, #tpu.memory_space<vmem>>, vector<1x32x24xf32>
    %3 = vector.shape_cast %2 : vector<1x32x24xf32> to vector<32x24xf32>
    %cst = arith.constant dense<0.000000e+00> : vector<8x24xf32>
    %4 = tpu.matmul %1, %3, %cst {dimension_numbers = #tpu.dot_dimension_numbers<[1], [0], [0], [1], [0, 0, 1, 1], [], []>} : vector<8x32xf32>, vector<32x24xf32>, vector<8x24xf32> -> vector<8x24xf32>
    %5 = vector.extract_strided_slice %4 {offsets = [0, 0], sizes = [8, 8], strides = [1, 1]} : vector<8x24xf32> to vector<8x8xf32>
    %cst_5 = arith.constant 0.353553385 : f32
    %6 = vector.broadcast %cst_5 : f32 to vector<8x8xf32>
    %7 = arith.mulf %5, %6 : vector<8x8xf32>
    %8 = vector.extract_strided_slice %4 {offsets = [0, 8], sizes = [8, 8], strides = [1, 1]} : vector<8x24xf32> to vector<8x8xf32>
    %9 = vector.extract_strided_slice %4 {offsets = [0, 16], sizes = [8, 8], strides = [1, 1]} : vector<8x24xf32> to vector<8x8xf32>
    %cst_6 = arith.constant dense<0.000000e+00> : vector<8x8xf32>
    %10 = tpu.matmul %7, %8, %cst_6 {dimension_numbers = #tpu.dot_dimension_numbers<[1], [1], [0], [0], [0, 0, 1, 0], [], []>} : vector<8x8xf32>, vector<8x8xf32>, vector<8x8xf32> -> vector<8x8xf32>
    %cst_7 = arith.constant dense<0xFF800000> : vector<8xf32>
    %11 = vector.multi_reduction <maximumf>, %10, %cst_7 [1] : vector<8x8xf32> to vector<8xf32>
    %12 = vector.shape_cast %11 : vector<8xf32> to vector<8x1xf32>
    %13 = vector.broadcast %12 : vector<8x1xf32> to vector<8x8xf32>
    %14 = arith.subf %10, %13 : vector<8x8xf32>
    %15 = math.exp %14 : vector<8x8xf32>
    %cst_8 = arith.constant dense<0.000000e+00> : vector<8xf32>
    %16 = vector.multi_reduction <add>, %15, %cst_8 [1] : vector<8x8xf32> to vector<8xf32>
    %17 = vector.shape_cast %16 : vector<8xf32> to vector<8x1xf32>
    %cst_9 = arith.constant dense<0.000000e+00> : vector<8x8xf32>
    %18 = tpu.matmul %15, %9, %cst_9 {dimension_numbers = #tpu.dot_dimension_numbers<[1], [0], [0], [1], [0, 0, 1, 1], [], []>} : vector<8x8xf32>, vector<8x8xf32>, vector<8x8xf32> -> vector<8x8xf32>
    %19 = tpu.reciprocal %17 : vector<8x1xf32> -> vector<8x1xf32>
    %20 = vector.broadcast %19 : vector<8x1xf32> to vector<8x8xf32>
    %21 = arith.mulf %18, %20 : vector<8x8xf32>
    %c0_10 = arith.constant 0 : index
    %c0_11 = arith.constant 0 : index
    %c0_12 = arith.constant 0 : index
    %c0_13 = arith.constant 0 : index
    %22 = vector.load %arg4[%c0_10, %c0_11, %c0_12, %c0_13] : memref<1x1x8x8xf32, #tpu.memory_space<vmem>>, vector<1x1x8x8xf32>
    %23 = vector.shape_cast %22 : vector<1x1x8x8xf32> to vector<8x8xf32>
    %24 = vector.shape_cast %21 : vector<8x8xf32> to vector<1x1x8x8xf32>
    tpu.vector_store %arg4[%c0_10, %c0_11, %c0_12, %c0_13], %24 {strides = array<i32>} : memref<1x1x8x8xf32, #tpu.memory_space<vmem>>, vector<1x1x8x8xf32>,
    return
  }
  func.func @transform_0(%arg0: i32, %arg1: i32) -> (i32, i32, i32) {
    %c0_i32 = arith.constant 0 : i32
    %c0_i32_0 = arith.constant 0 : i32
    %c0_i32_1 = arith.constant 0 : i32
    return %arg0, %c0_i32, %c0_i32_0 : i32, i32, i32
  }
  func.func @transform_1(%arg0: i32, %arg1: i32) -> (i32, i32, i32) {
    %c0_i32 = arith.constant 0 : i32
    %c0_i32_0 = arith.constant 0 : i32
    %c0_i32_1 = arith.constant 0 : i32
    return %arg1, %c0_i32, %c0_i32_0 : i32, i32, i32
  }
  func.func @transform_2(%arg0: i32, %arg1: i32) -> (i32, i32, i32, i32) {
    %c0_i32 = arith.constant 0 : i32
    %c0_i32_0 = arith.constant 0 : i32
    %c0_i32_1 = arith.constant 0 : i32
    return %arg0, %arg1, %c0_i32, %c0_i32_0 : i32, i32, i32, i32
  }
}

</mosaic_0001>

<bundles_post_ra>
// kernel: multi_head_attention.1
= control target key start
LH: loop header
LB: loop body
LE: loop exit
PB: predicated region body
PF: predicated region fallthrough
CT: control target
= control target key end

     0   :  { %s1346_s0 = inlined_call_operand.hbm [shape: f32[2,8,32], index: 0, kind: input, shape index: {}]   ;;  %s1347_s1 = inlined_call_operand.hbm [shape: f32[4,32,24], index: 1, kind: input, shape index: {}]   ;;  %s1348_s2 = inlined_call_operand.hbm [shape: f32[2,4,8,8], index: 2, kind: output, shape index: {}]  }
   0x1   :  { %1360 = sst [smem:[#allocation17_spill]] %s1346_s0 }
   0x2   :  { %1361 = sst [smem:[#allocation18_spill]] %s1348_s2 }
   0x3   :  { %7 = vsyncpa [#allocation3], 0 }
   0x4   :  { %9 = vsyncpa [#allocation3 + $0x1], 0 }
   0x5   :  { %10 = vsyncpa [#allocation6], 0 }
   0x6   :  { %12 = vsyncpa [#allocation6 + $0x1], 0 }
   0x7   :  { %13 = vsyncpa [#allocation4], 0 }
   0x8   :  { %15 = vsyncpa [#allocation4 + $0x1], 0  ;;  %s1020_s9 = smov 0   ;;  %s1022_s10 = smov 0  }
   0x9   :  { %s1024_s11 = smov 0   ;;  %s1026_s12 = smov 0  }
   0xa   :  { %s1028_s13 = smov 0   ;;  %s1030_s14 = smov 0  }
   0xb   :  { %s1032_s15 = smov 0   ;;  %s1034_s16 = smov 0  }
   0xc   :  { %s1036_s17 = smov 0   ;;  %s1038_s18 = smov 0  }
   0xd   :  { %s1040_s19 = smov 0   ;;  %s1042_s20 = smov 0  }
   0xe   :  { %s1044_s21 = smov 0   ;;  %s1046_s22 = smov 0  }
   0xf LB: > { %1362 = sst [smem:[#allocation11_spill]] %s941_s9  ;;  %s582_s23 = sadd.s32 4294967295, %s993_s22   ;;  %s993_s22 = sphi %s1046_s22, %s21_s22   ;;  %s989_s21 = sphi %s1044_s21, %s1392_s21   ;;  %s985_s20 = sphi %s1042_s20, %s1403_s20   ;;  %s981_s19 = sphi %s1040_s19, %s1390_s19   ;;  %s977_s18 = sphi %s1038_s18, %s1402_s18   ;;  %s973_s17 = sphi %s1036_s17, %s1401_s17   ;;  %s969_s16 = sphi %s1034_s16, %s1400_s16   ;;  %s965_s15 = sphi %s1032_s15, %s1399_s15   ;;  %s961_s14 = sphi %s1030_s14, %s1398_s14   ;;  %s957_s13 = sphi %s1028_s13, %s1397_s13   ;;  %s953_s12 = sphi %s1026_s12, %s1396_s12   ;;  %s949_s11 = sphi %s1024_s11, %s1395_s11   ;;  %s945_s10 = sphi %s1022_s10, %s1394_s10   ;;  %s941_s9 = sphi %s1020_s9, %s1393_s9  }
  0x10   : > { %1363 = sst [smem:[#allocation12_spill]] %s989_s21  ;;  %s33_s24 = sadd.s32 1, %s989_s21 }
  0x11   : > { %1364 = sst [smem:[#allocation13_spill]] %s993_s22  ;;  %p47_p0 = scmp.ne.s32.totalorder %s973_s17, %s969_s16 }
  0x12   : > { %p48_p1 = scmp.eq.s32.totalorder %s993_s22, 0  ;;  %p53_p2 = scmp.ne.s32.totalorder %s969_s16, %s965_s15 }
  0x13   : > { %p54_p3 = scmp.eq.s32.totalorder %s582_s23, 0  ;;  %p73_p4 = scmp.ne.s32.totalorder %s961_s14, %s957_s13 }
  0x14   : > { %p1095_p5 = por %p48_p1, %p47_p0  ;;  %p79_p6 = scmp.ne.s32.totalorder %s957_s13, %s953_s12 }
  0x15   : > { %p1100_p7 = por %p54_p3, %p53_p2  ;;  %p75_p8 = por %p73_p4, %p48_p1 }
  0x16   : > { %p1104_p9 = por %p79_p6, %p54_p3  ;;  %p1108_p10 = scmp.eq.s32.totalorder %s582_s23, 7 }
  0x17   : > { %s1366_s27 = scalar_select %p1100_p7, 1, 0 }
  0x18   : > { %s1367_s28 = scalar_select %p1104_p9, 1, 0 }
  0x19   : > { %p658_p11 = scmp.lt.s32.totalorder %s993_s22, 8  ;;  %s131_s30 = sand.u32 1, %s973_s17  }
  0x1a   : > { %s587_s3 = sshll.u32 %s989_s21, 7  ;;  %s586_s4 = sshll.u32 %s131_s30, 3 }
  0x1b   : > { %s1369_s0 = sld [smem:[#allocation17_spill]]  ;;  %s135_s8 = scalar_lea.vmem [#allocation2], %s586_s4 }
  0x1c   : > { %s142_s12 = sshll.u32 %s135_s8, 4  ;;  %p1122_p12 = pnand %p658_p11, %p1095_p5  ;;  %s1126_s12 = int_to_ptr.vmem [resolvable:$true] %s142_s12 }
  0x1d   : > { %p1128_p13 = pnand %p658_p11, %p75_p8 }
  0x1e   : > { %p785_p2 = pneg %p1122_p12 }
  0x1f   : > { %s1371_s23 = scalar_select %p1128_p13, 1, 0 }
  0x21   : > { %s1118_s7 = scalar_lea.hbm %s1369_s0, %s587_s3  ;;  %s132_s3 = scalar_lea.sflag [#allocation3], %s131_s30 }
  0x22   : > { %s783_s5 = scalar_lea.hbm %s1118_s7, 128  ;;  %s788_s6 = scalar_lea.hbm %s1369_s0, 256 }
  0x23   : > { %p784_p1 = scmp.ne.s32.totalorder %s1118_s7, %s783_s5  ;;  %p789_p5 = scmp.lt.u32.totalorder %s1118_s7, %s1369_s0 }
  0x24   : > { %p790_p6 = scmp.lt.u32.totalorder %s788_s6, %s783_s5  ;;  %p792_p11 = scmp.lt.u32.totalorder %s783_s5, %s1118_s7 }
  0x25   : > { %p786_p3 = pnand %p785_p2, %p784_p1 }
  0x26   : > { %p791_p8 = por %p790_p6, %p789_p5 }
  0x27   : > { %p787_p4 = pneg %p786_p3 }
  0x28   : > { %p793_p0 = por %p792_p11, %p791_p8 }
  0x2a   : > { %p794_p9 = pnand %p793_p0, %p787_p4 }
  0x2c   : > { %797 = shalt.err (!%p794_p9)
}
  0x2d   : > { %s798_s30 = scalar_lea.vmem %s1126_s12, 128  ;;  %s995_s26 = smov [#allocation2]  }
  0x2e   : > { %p799_p1 = scmp.ne.s32.totalorder %s1126_s12, %s798_s30  ;;  %s803_s4 = sshll.u32 %s995_s26, 4  ;;  %s804_s4 = int_to_ptr.vmem [resolvable:$false] %s803_s4 }
  0x2f   : > { %s805_s25 = scalar_lea.vmem %s804_s4, 256  ;;  %p806_p13 = scmp.lt.s32.totalorder %s1126_s12, %s804_s4 }
  0x30   : > { %p801_p3 = pnand %p799_p1, %p785_p2  ;;  %p807_p5 = scmp.lt.s32.totalorder %s805_s25, %s798_s30 }
  0x32   : > { %p802_p7 = pneg %p801_p3  ;;  %p808_p6 = por %p807_p5, %p806_p13 }
  0x34   : > { %p809_p8 = pnand %p808_p6, %p802_p7 }
  0x36   : > { %812 = shalt.err (!%p809_p8)
}
  0x37   : > { %650 = dma.hbm_to_vmem [thread:$0]  (!%p1122_p12), %s1118_s7, 128, %s1126_s12, %s132_s3  }
  0x38   : > { %p168_p7 = scmp.lt.s32.totalorder %s993_s22, 9  ;;  %p1372_p9 = scmp.ge.s32.totalorder %s993_s22, 1 }
  0x39   : > { %s583_s5 = sadd.s32 4294967294, %s993_s22   ;;  %s30_s6 = sadd.s32 1, %s985_s20 }
  0x3a   : > { %p1161_p13 = pnand %p1372_p9, %p168_p7  ;;  %s66_s8 = sadd.s32 1, %s961_s14 }
  0x3b   : > { %p31_p0 = scmp.ge.s32.totalorder %s30_s6, 4  ;;  %s94_s30 = sadd.s32 1, %s949_s11 }
  0x3c   : > { %p104_p2 = scmp.ne.s32.totalorder %s949_s11, %s945_s10  ;;  %p110_p4 = scmp.ne.s32.totalorder %s945_s10, %s941_s9 }
  0x3d   : > { %s1405_s6 = smov (%p31_p0, %s30_s6), 0  ;;  %s1407_s24 = smov (!%p31_p0, %s33_s24), %s989_s21 }
  0x3e   : > { %1374 = sst [smem:[#allocation14_spill]] %s1405_s6  ;;  %s63_s7 = ssub.s32 %s985_s20, %s1405_s6 }
  0x3f   : > { %p1182_p12 = por %p1108_p10, %p104_p2  ;;  %p35_p11 = scmp.ge.s32.totalorder %s1407_s24, 2 }
  0x40   : > { %p64_p1 = scmp.eq.s32.totalorder %s63_s7, 0  ;;  %p111_p3 = scmp.eq.s32.totalorder %s583_s5, 7 }
  0x41   : > { %s1375_s12 = scalar_select %p1182_p12, 1, 0 }
  0x42   : > { %s149_s3 = sand.u32 1, %s961_s14   ;;  %s1409_s24 = smov (%p35_p11, %s1407_s24), 0 }
  0x43   : > { %1376 = sst [smem:[#allocation15_spill]] %s1409_s24  ;;  %s37_s4 = ssub.s32 %s989_s21, %s1409_s24 }
  0x44   : > { %s1190_s26 = scalar_select %p64_p1, %s961_s14, %s66_s8  }
  0x45   : > { %p1194_p5 = por %p111_p3, %p110_p4  ;;  %p38_p10 = scmp.eq.s32.totalorder %s37_s4, 0 }
  0x46   : > { %1377 = sst [smem:[#allocation16_spill]] %s1190_s26  ;;  %s91_s29 = sor.u32 %s63_s7, %s37_s4 }
  0x47   : > { %s1378_s25 = scalar_select %p1194_p5, 1, 0 }
  0x48   : > { %p92_p6 = scmp.eq.s32.totalorder %s91_s29, 0  ;;  %s1379_s0 = sadd.s32 1, %s973_s17 }
  0x49   : > { %s1201_s6 = scalar_select %p38_p10, %s973_s17, %s1379_s0  }
  0x4a   : > { %s1204_s5 = scalar_select %p92_p6, %s949_s11, %s94_s30  }
  0x4b   : > { %s588_s9 = sshll.u32 %s149_s3, 5  ;;  %s604_s22 = sshll.u32 %s985_s20, 9 }
  0x4c   : > { %s1210_s24 = scalar_lea.hbm %s1347_s1, %s604_s22  ;;  %s153_s21 = scalar_lea.vmem [#allocation5], %s588_s9 }
  0x4d   : > { %s160_s26 = sshll.u32 %s153_s21, 4  ;;  %s1214_s7 = scalar_lea.sflag [#allocation6], %s149_s3  ;;  %s1212_s26 = int_to_ptr.vmem [resolvable:$true] %s160_s26 }
  0x4e   : > { %s813_s0 = scalar_lea.hbm %s1210_s24, 512  ;;  %p1380_p7 = scmp.ne.s32.totalorder %s1371_s23, 0 }
  0x4f   : > { %p814_p8 = scmp.ne.s32.totalorder %s1210_s24, %s813_s0  ;;  %s818_s30 = scalar_lea.hbm %s1347_s1, 2048 }
  0x50   : > { %p815_p9 = pneg %p1380_p7  ;;  %p819_p4 = scmp.lt.u32.totalorder %s1210_s24, %s1347_s1 }
  0x51   : > { %p820_p11 = scmp.lt.u32.totalorder %s818_s30, %s813_s0  ;;  %p822_p3 = scmp.lt.u32.totalorder %s813_s0, %s1210_s24 }
  0x52   : > { %p816_p0 = pnand %p815_p9, %p814_p8 }
  0x53   : > { %p821_p1 = por %p820_p11, %p819_p4 }
  0x54   : > { %p817_p2 = pneg %p816_p0 }
  0x55   : > { %p823_p10 = por %p822_p3, %p821_p1 }
  0x57   : > { %p824_p6 = pnand %p823_p10, %p817_p2 }
  0x59   : > { %827 = shalt.err (!%p824_p6)
}
  0x5a   : > { %s828_s9 = scalar_lea.vmem %s1212_s26, 512  ;;  %s996_s21 = smov [#allocation5]  }
  0x5b   : > { %p829_p8 = scmp.ne.s32.totalorder %s1212_s26, %s828_s9  ;;  %s833_s3 = sshll.u32 %s996_s21, 4  ;;  %s834_s3 = int_to_ptr.vmem [resolvable:$false] %s833_s3 }
  0x5c   : > { %s835_s8 = scalar_lea.vmem %s834_s3, 1024  ;;  %p836_p12 = scmp.lt.s32.totalorder %s1212_s26, %s834_s3 }
  0x5d   : > { %p831_p0 = pnand %p829_p8, %p815_p9  ;;  %p837_p4 = scmp.lt.s32.totalorder %s835_s8, %s828_s9 }
  0x5f   : > { %p832_p5 = pneg %p831_p0  ;;  %p838_p11 = por %p837_p4, %p836_p12 }
  0x61   : > { %p839_p1 = pnand %p838_p11, %p832_p5 }
  0x63   : > { %842 = shalt.err (!%p839_p1)
}
  0x64   : > { %s997_s0 = smov 128   ;;  %s998_s2 = smov 8  }
  0x65   : > { %653 = dma.hbm_to_vmem [thread:$0]  (!%p1380_p7), %s1210_s24, 512, %s1212_s26, %s1214_s7, %s997_s0, %s997_s0, %s998_s2  }
  0x66   : > { %172 = sbr.rel (%p1161_p13) target bundleno = 1052 (0x41c), region = 28  ;;  %s174_s22 = sand.u32 (!%p1161_p13), 1, %s969_s16  }
  0x67   : > { %s592_s30 = sshll.u32 (!%p1161_p13), %s174_s22, 3  ;;  %s175_s4 = scalar_lea.sflag (!%p1161_p13), [#allocation3], %s174_s22 }
  0x68   : > { %s178_s29 = scalar_lea.vmem (!%p1161_p13), [#allocation2], %s592_s30  ;;  %p1381_p12 = scmp.ne.s32.totalorder (!%p1161_p13), %s1366_s27, 0 }
  0x6d   : > { %928 = dma.done.wait (%p1381_p12), %s175_s4, 128  }
  0x6e   : > { %930 = vsyncadd (%p1381_p12), %s175_s4, 4294967168  ;;  %s183_s9 = sand.u32 1, %s957_s13   ;;  %p1382_p5 = scmp.ne.s32.totalorder %s1367_s28, 0 }
  0x6f   : > { %s593_s21 = sshll.u32 %s183_s9, 5  ;;  %s184_s23 = scalar_lea.sflag [#allocation6], %s183_s9 }
  0x70   : > { %s187_s24 = scalar_lea.vmem [#allocation5], %s593_s21 }
  0x71   : > { %932 = dma.done.wait (%p1382_p5), %s184_s23, 512  }
  0x72   : > { %934 = vsyncadd (%p1382_p5), %s184_s23, 4294966784  ;;  %v999_v0 = vmov 0.0|0.0   ;;  %vm1000_vm0 = vmmov 0   ;;  %v1001_v1 = vmov 0.0   ;;  %v214_v2 = vld [vmem:[%s187_s24] sm:$0xff]  ;;  %v215_v3 = vld [vmem:[%s187_s24 + $0x8] sm:$0xff] }
  0x73   : > { %635 = vmatprep.subr.bf16.mxu0 %v999_v0  ;;  %622 = vmatprep.mubr.msk.f32.mxu0 %vm1000_vm0, %v1001_v1  ;;  %v216_v4 = vld [vmem:[%s187_s24 + $0x10] sm:$0xff]  ;;  %v636_v5 = vpack.c.bf16 %v215_v3, %v214_v2  ;;  %v217_v6 = vld [vmem:[%s187_s24 + $0x18] sm:$0xff]  ;;  %vm218_vm1 = vcmask 261120   ;;  %s1002_s27 = smov 112   ;;  %s1003_s28 = smov 120   ;;  %vm296_vm2 = vcmask 64512  }
  0x74   : > { %625 = vmatprep.subr.mxu1 %v1001_v1  ;;  %627 = vmatprep.mubr.msk.f32.mxu1 %vm1000_vm0, %v1001_v1  ;;  %v639_v7 = vpack.c.bf16 %v217_v6, %v216_v4  ;;  %v213_v8 = vld [vmem:[%s178_s29] sm:$0xff]  ;;  %s210_s15 = sand.u32 1, %s945_s10   ;;  %s600_s7 = sshll.u32 %s981_s19, 2 }
  0x75   : > { %637 = vmatpush3.bf16.msra.mxu0 %v636_v5  ;;  %s594_s26 = sshll.u32 %s210_s15, 3  ;;  %s472_s3 = sadd.s32 %s977_s18, %s600_s7 }
  0x76   : > { %638 = vmatprep.subr.bf16.mxu0 %v999_v0  ;;  %s601_s8 = sshll.u32 %s472_s3, 7  ;;  %s212_s0 = scalar_lea.vmem [#allocation7], %s594_s26 }
  0x77   : > { %s476_s2 = sshll.u32 %s212_s0, 4  ;;  %s1383_s4 = sld [smem:[#allocation18_spill]]  ;;  %s1270_s2 = int_to_ptr.vmem [resolvable:$true] %s476_s2 }
  0x78   : > { %s461_s18 = scalar_lea.sflag [#allocation4], %s210_s15  ;;  %s843_s19 = scalar_lea.vmem %s1270_s2, 128 }
  0x79   : > { %640 = vmatpush3.bf16.msra.mxu0 %v639_v7  ;;  %p844_p13 = scmp.ne.s32.totalorder %s1270_s2, %s843_s19  ;;  %p1384_p7 = scmp.ne.s32.totalorder %s1375_s12, 0 }
  0x7a   : > { %s1004_s9 = smov [#allocation7]  }
  0x7b   : > { %p845_p9 = pnand %p844_p13, %p1384_p7  ;;  %s847_s21 = sshll.u32 %s1004_s9, 4  ;;  %s848_s21 = int_to_ptr.vmem [resolvable:$false] %s847_s21 }
  0x7c   : > { %623 = vmatmul.mubr.msk.f32.vlgmr.msra.gmra.mrb[0].mxu0 %vm218_vm1, %v213_v8  ;;  %s849_s23 = scalar_lea.vmem %s848_s21, 256  ;;  %p850_p3 = scmp.lt.s32.totalorder %s1270_s2, %s848_s21 }
  0x7d   : > { %s1268_s29 = scalar_lea.hbm %s1383_s4, %s601_s8  ;;  %p846_p2 = pneg %p845_p9 }
  0x7e   : > { %p851_p10 = scmp.lt.s32.totalorder %s849_s23, %s843_s19 }
  0x80   : > { %p852_p6 = por %p851_p10, %p850_p3 }
  0x82   : > { %p853_p8 = pnand %p852_p6, %p846_p2 }
 0x14f   : > { %v288_v9 = vpop.f32.mrb[0].mxu0 }
 0x150   : > { %381 = vrot.lane.b32.xlu1 %v288_v9, %s1002_s27  ;;  %294 = vrot.lane.b32.xlu0 %v288_v9, %s1003_s28  ;;  %v624_v10 = vpop.f32.mrb[1].mxu0  ;;  %v292_v12 = vmul.f32 0.35355338, %v288_v9 }
 0x1c2   : > { %v295_v11 = vpop.permute.xlu0 %294  ;;  %v382_v13 = vpop.permute.xlu1 %381 }
 0x1c3   : > { %626 = vmatpush3.xpose.msk.msra.mxu1 %vm296_vm2, %v295_v11 }
 0x1c4   : > { %630 = vmatprep.subr.mxu1 %v1001_v1 }
 0x1c6   : > { %628 = vmatmul.mubr.msk.f32.vlgmr.msra.gmra.mrb[0].mxu1 %vm296_vm2, %v292_v12 }
 0x1c7   : > { %631 = vmatpush3.msra.mxu1 %v382_v13  ;;  %632 = vmatprep.mubr.msk.f32.mxu1 %vm1000_vm0, %v1001_v1 }
 0x299   : > { %v368_v14 = vpop.f32.mrb[0].mxu1 }
 0x29a   : > { %v629_v15 = vpop.f32.mrb[1].mxu1  ;;  %v372_v16 = vsel %vm296_vm2, %v368_v14, -inf }
 0x29b   : > { %373 = vmax.xlane.f32.xlu0 %v372_v16 }
 0x328   : > { %v374_v17 = vpop.xlane.xlu0 %373 }
 0x329   : > { %v375_v18 = vsub.f32 %v368_v14, %v374_v17 }
 0x32b   : > { %v376_v19 = vmul.f32 1.442695, %v375_v18 }
 0x32d   : > { %779 = vpow2.f32 %v376_v19 }
 0x337   : > { %v780_v20 = vpop.eup %779 }
 0x338   : > { %633 = vmatmul.mubr.msk.f32.vlgmr.msra.gmra.mrb[2].mxu1 %vm296_vm2, %v780_v20  ;;  %v378_v21 = vsel %vm296_vm2, %v780_v20, 0.0 }
 0x339   : > { %379 = vadd.xlane.f32.xlu1 %v378_v21 }
 0x3c6   : > { %v380_v22 = vpop.xlane.xlu1 %379 }
 0x3c7   : > { %781 = vrcp.f32 %v380_v22 }
 0x3d1   : > { %v782_v23 = vpop.eup %781 }
 0x40b   : > { %v453_v24 = vpop.f32.mrb[2].mxu1 }
 0x40c   : > { %v458_v25 = vmul.f32 %v782_v23, %v453_v24  ;;  %v634_v26 = vpop.f32.mrb[3].mxu1 }
 0x40e   : > { %459 = vst.msk [vmem:[%s212_s0] sm:$0xff] %vm296_vm2, %v458_v25 }
 0x40f   : > { %856 = shalt.err (!%p853_p8)
}
 0x410   : > { %s857_s24 = scalar_lea.hbm %s1268_s29, 128  ;;  %s861_s15 = scalar_lea.hbm %s1383_s4, 1024 }
 0x411   : > { %p858_p0 = scmp.ne.s32.totalorder %s1268_s29, %s857_s24  ;;  %p862_p1 = scmp.lt.u32.totalorder %s1268_s29, %s1383_s4 }
 0x412   : > { %p863_p12 = scmp.lt.u32.totalorder %s861_s15, %s857_s24  ;;  %p865_p13 = scmp.lt.u32.totalorder %s857_s24, %s1268_s29 }
 0x413   : > { %p859_p4 = pnand %p858_p0, %p1384_p7 }
 0x414   : > { %p864_p5 = por %p863_p12, %p862_p1 }
 0x415   : > { %p860_p11 = pneg %p859_p4 }
 0x416   : > { %p866_p9 = por %p865_p13, %p864_p5 }
 0x418   : > { %p867_p2 = pnand %p866_p9, %p860_p11 }
 0x41a   : > { %870 = shalt.err (!%p867_p2)
}
 0x41b   : > { %645 = dma.vmem_to_hbm [thread:$0]  (%p1384_p7), %s1270_s2, 128, %s1268_s29, %s461_s18  }
 0x41c PF: > { %s1385_s3 = sld [smem:[#allocation13_spill]]  ;;  %s1386_s8 = sld [smem:[#allocation11_spill]] }
 0x41d   : > { %p1387_p10 = scmp.ne.s32.totalorder %s1378_s25, 0 }
 0x422   : > { %p659_p3 = scmp.ge.s32.totalorder %s1385_s3, 2  ;;  %s488_s0 = sand.u32 1, %s1386_s8  }
 0x423   : > { %s489_s22 = scalar_lea.sflag [#allocation4], %s488_s0 }
 0x424   : > { %p655_p6 = pnand %p659_p3, %p1387_p10 }
 0x426   : > { %936 = dma.done.wait (!%p655_p6), %s489_s22, 128  }
 0x427   : > { %938 = vsyncadd (!%p655_p6), %s489_s22, 4294967168  ;;  %s21_s22 = sadd.s32 1, %s1385_s3   ;;  %s1389_s2 = sld [smem:[#allocation16_spill]] }
 0x428   : > { %p1299_p8 = scmp.ge.s32.totalorder %s21_s22, 10   ;;  %s1390_s19 = sld [smem:[#allocation12_spill]] }
 0x429   : > { %s1391_s25 = sld [smem:[#allocation14_spill]]  ;;  %s1392_s21 = sld [smem:[#allocation15_spill]] }
 0x42a   : > { %s1393_s9 = smov %s945_s10  ;;  %s1394_s10 = smov %s949_s11 }
 0x42b   : > { %s1395_s11 = smov %s1204_s5  ;;  %s1396_s12 = smov %s957_s13 }
 0x42c   : > { %s1397_s13 = smov %s961_s14  ;;  %s1399_s15 = smov %s969_s16 }
 0x42d   : > { %s1398_s14 = smov %s1389_s2  ;;  %s1400_s16 = smov %s973_s17 }
 0x42e   : > { %s1401_s17 = smov %s1201_s6  ;;  %s1402_s18 = smov %s985_s20 }
 0x42f   : > { %s1403_s20 = smov %s1391_s25  ;;  %20 = sbr.rel (!%p1299_p8) target bundleno = 15 (0xf), region = 86 }
 0x436   :  { %494 = vsyncpa [#allocation3], 1 }
 0x437   :  { %496 = vsyncpa [#allocation3 + $0x1], 1 }
 0x438   :  { %497 = vsyncpa [#allocation6], 1 }
 0x439   :  { %499 = vsyncpa [#allocation6 + $0x1], 1 }
 0x43a   :  { %500 = vsyncpa [#allocation4], 1 }
 0x43b   :  { %502 = vsyncpa [#allocation4 + $0x1], 1 }

</bundles_post_ra>
